<compile_context>
chip_gen: v7x
topology: tpu7x:2x2x1
jax: 0.10.0
libtpu: 0.0.40
codegen_flags: <defaults>
</compile_context>

<pallas_src>
import jax
import jax.numpy as jnp
from jax.experimental import pallas as pl
from jax.experimental.pallas import tpu as pltpu

# Hidden sizes fixed by the module definition.
H1, H2, H3 = 128, 64, 32
SUBLANE = 8  # sublane granularity for the batch tile


def _round_up(x, m):
    return (x + m - 1) // m * m


def mlp_kernel(x_ref,
               w1_ref, b1_ref,
               w2_ref, b2_ref,
               w3_ref, b3_ref,
               w4_ref, b4_ref,
               o_ref):
    cdt = w1_ref.dtype  # compute dtype fed to the MXU (bf16 default, f32 optional)

    # Layer 1: Linear(d_in, 128) + ReLU   (Dropout(0.2) -> identity in eval mode)
    h = jnp.dot(x_ref[...].astype(cdt), w1_ref[...],
                preferred_element_type=jnp.float32)
    h = jnp.maximum(h + b1_ref[...], 0.0)
    # TODO(synk): train-mode Dropout(0.2) would need pltpu.prng_seed/prng_random_bits
    # masking; this kernel matches model.eval() forward semantics (dropout = identity).

    # Layer 2: Linear(128, 64) + ReLU
    h = jnp.dot(h.astype(cdt), w2_ref[...], preferred_element_type=jnp.float32)
    h = jnp.maximum(h + b2_ref[...], 0.0)

    # Layer 3: Linear(64, 32) + ReLU
    h = jnp.dot(h.astype(cdt), w3_ref[...], preferred_element_type=jnp.float32)
    h = jnp.maximum(h + b3_ref[...], 0.0)

    # Layer 4: Linear(32, n_cls)  (logits, no activation)
    out = jnp.dot(h.astype(cdt), w4_ref[...],
                  preferred_element_type=jnp.float32) + b4_ref[...]
    o_ref[...] = out.astype(o_ref.dtype)


def mlp_forward(x, params, *, block_b=None, compute_dtype=jnp.bfloat16):
    """x: [B, d_in] (f32 or bf16). params: w1..w4 ([in, out]) and b1..b4 ([1, out]).

    Returns [B, n_cls] logits (same dtype as x).  No host-side padding or slicing.
    """
    B, d_in = x.shape
    n_cls = params["w4"].shape[1]

    # Batch tile: multiple of 8 sublanes, target ~1024 rows/step; prefer an even
    # step count (>=2 when the batch is large enough) so ("parallel",) can shard
    # the grid across both TensorCores on v7x.  VMEM is not the constraint here.
    if block_b is None:
        n_steps = pl.cdiv(B, 1024)
        if B >= 256:
            n_steps = max(n_steps, 2)
        if n_steps > 1 and n_steps % 2 == 1:
            n_steps += 1
        block_b = _round_up(pl.cdiv(B, n_steps), SUBLANE)
    else:
        block_b = _round_up(block_b, SUBLANE)
    block_b = max(SUBLANE, min(block_b, _round_up(B, SUBLANE)))
    grid = (pl.cdiv(B, block_b),)  # ragged B: last block is boundary-masked by Pallas

    # One-off tiny host casts of the resident weights (<100 KiB total).
    # Biases stay f32: the bias+ReLU epilogue runs in f32.
    w1 = params["w1"].astype(compute_dtype)
    w2 = params["w2"].astype(compute_dtype)
    w3 = params["w3"].astype(compute_dtype)
    w4 = params["w4"].astype(compute_dtype)
    b1 = params["b1"].astype(jnp.float32)
    b2 = params["b2"].astype(jnp.float32)
    b3 = params["b3"].astype(jnp.float32)
    b4 = params["b4"].astype(jnp.float32)

    def resident(arr):
        # whole array, same block every grid step (stays resident in VMEM)
        return pl.BlockSpec(arr.shape, lambda i: (0, 0))

    out = pl.pallas_call(
        mlp_kernel,
        out_shape=jax.ShapeDtypeStruct((B, n_cls), x.dtype),
        grid_spec=pltpu.PrefetchScalarGridSpec(
            num_scalar_prefetch=0,
            grid=grid,
            in_specs=[
                pl.BlockSpec((block_b, d_in), lambda i: (i, 0)),  # x tile over batch
                resident(w1), resident(b1),
                resident(w2), resident(b2),
                resident(w3), resident(b3),
                resident(w4), resident(b4),
            ],
            out_specs=pl.BlockSpec((block_b, n_cls), lambda i: (i, 0)),
        ),
        compiler_params=pltpu.CompilerParams(
            dimension_semantics=("parallel",),
            # Not a real lever here (working set < a few MiB even at block_b=2048);
            # kept explicit and safely under v7x's 64 MiB physical VMEM.
            vmem_limit_bytes=32 * 1024 * 1024,
        ),
    )(x, w1, b1, w2, b2, w3, b3, w4, b4)
    return out


def init_params(key, d_in, n_cls):
    """Deterministic init mimicking nn.Linear's uniform(-1/sqrt(fan_in), 1/sqrt(fan_in))."""
    dims = [(d_in, H1), (H1, H2), (H2, H3), (H3, n_cls)]
    params = {}
    keys = jax.random.split(key, 2 * len(dims))
    for li, (fin, fout) in enumerate(dims):
        bound = 1.0 / (fin ** 0.5)
        w = jax.random.uniform(keys[2 * li], (fin, fout), jnp.float32, -bound, bound)
        b = jax.random.uniform(keys[2 * li + 1], (1, fout), jnp.float32, -bound, bound)
        params[f"w{li + 1}"] = w
        params[f"b{li + 1}"] = b
    return params


def mlp_reference(x, params):
    h = jnp.maximum(x @ params["w1"] + params["b1"], 0.0)
    h = jnp.maximum(h @ params["w2"] + params["b2"], 0.0)
    h = jnp.maximum(h @ params["w3"] + params["b3"], 0.0)
    return h @ params["w4"] + params["b4"]


if __name__ == "__main__":
    key = jax.random.PRNGKey(0)
    d_in, n_cls = 32, 8

    k_x, k_p, k_x2, k_x3 = jax.random.split(key, 4)
    params = init_params(k_p, d_in, n_cls)

    # 1) small batch, single grid step, f32 compute -> bit-tight vs reference
    batch = 8
    x = jax.random.normal(k_x, (batch, d_in), dtype=jnp.float32)
    out = jax.block_until_ready(mlp_forward(x, params, compute_dtype=jnp.float32))
    ref = mlp_reference(x, params)
    assert out.shape == (batch, n_cls)
    assert jnp.allclose(out, ref, atol=1e-5, rtol=1e-5)

    # 2) ragged batch + multi-step grid, f32 compute -> verifies boundary masking exactly
    batch2 = 20
    x2 = jax.random.normal(k_x2, (batch2, d_in), dtype=jnp.float32)
    out2 = jax.block_until_ready(
        mlp_forward(x2, params, block_b=8, compute_dtype=jnp.float32))
    ref2 = mlp_reference(x2, params)
    assert out2.shape == (batch2, n_cls)
    assert jnp.allclose(out2, ref2, atol=1e-5, rtol=1e-5)

    # 3) default bf16 compute (f32 accumulation) -> loose tolerance
    batch3 = 16
    x3 = jax.random.normal(k_x3, (batch3, d_in), dtype=jnp.float32)
    out3 = jax.block_until_ready(mlp_forward(x3, params))  # bf16 weights/compute
    ref3 = mlp_reference(x3, params)
    assert out3.shape == (batch3, n_cls)
    assert jnp.allclose(out3, ref3, atol=5e-2, rtol=5e-2)

    print("KERNEL_OK")
</pallas_src>

<mosaic_0001>
module attributes {stable_mosaic.version = 11 : i64} {
  func.func @mlp_kernel(%arg0: i32, %arg1: memref<8x32xf32, #tpu.memory_space<vmem>>, %arg2: memref<32x128xf32, #tpu.memory_space<vmem>>, %arg3: memref<1x128xf32, #tpu.memory_space<vmem>>, %arg4: memref<128x64xf32, #tpu.memory_space<vmem>>, %arg5: memref<1x64xf32, #tpu.memory_space<vmem>>, %arg6: memref<64x32xf32, #tpu.memory_space<vmem>>, %arg7: memref<1x32xf32, #tpu.memory_space<vmem>>, %arg8: memref<32x8xf32, #tpu.memory_space<vmem>>, %arg9: memref<1x8xf32, #tpu.memory_space<vmem>>, %arg10: memref<8x8xf32, #tpu.memory_space<vmem>>) attributes {dimension_semantics = [#tpu.dimension_semantics<parallel>], iteration_bounds = array<i64: 1>, scalar_prefetch = 0 : i64, scratch_operands = 0 : i64, tpu.core_type = #tpu.core_type<tc>, window_params = [{transform_indices = @transform_0, window_bounds = array<i64: 8, 32>}, {pipeline_mode = #tpu.pipeline_mode<synchronous>, transform_indices = @transform_1, window_bounds = array<i64: 32, 128>}, {pipeline_mode = #tpu.pipeline_mode<synchronous>, transform_indices = @transform_2, window_bounds = array<i64: 1, 128>}, {pipeline_mode = #tpu.pipeline_mode<synchronous>, transform_indices = @transform_3, window_bounds = array<i64: 128, 64>}, {pipeline_mode = #tpu.pipeline_mode<synchronous>, transform_indices = @transform_4, window_bounds = array<i64: 1, 64>}, {pipeline_mode = #tpu.pipeline_mode<synchronous>, transform_indices = @transform_5, window_bounds = array<i64: 64, 32>}, {pipeline_mode = #tpu.pipeline_mode<synchronous>, transform_indices = @transform_6, window_bounds = array<i64: 1, 32>}, {pipeline_mode = #tpu.pipeline_mode<synchronous>, transform_indices = @transform_7, window_bounds = array<i64: 32, 8>}, {pipeline_mode = #tpu.pipeline_mode<synchronous>, transform_indices = @transform_8, window_bounds = array<i64: 1, 8>}, {transform_indices = @transform_9, window_bounds = array<i64: 8, 8>}]} {
    %c0 = arith.constant 0 : index
    %c0_0 = arith.constant 0 : index
    %0 = vector.load %arg1[%c0, %c0_0] : memref<8x32xf32, #tpu.memory_space<vmem>>, vector<8x32xf32>
    %c0_1 = arith.constant 0 : index
    %c0_2 = arith.constant 0 : index
    %1 = vector.load %arg2[%c0_1, %c0_2] : memref<32x128xf32, #tpu.memory_space<vmem>>, vector<32x128xf32>
    %cst = arith.constant dense<0.000000e+00> : vector<8x128xf32>
    %2 = tpu.matmul %0, %1, %cst {dimension_numbers = #tpu.dot_dimension_numbers<[1], [0], [0], [1], [0, 0, 1, 1], [], []>} : vector<8x32xf32>, vector<32x128xf32>, vector<8x128xf32> -> vector<8x128xf32>
    %c0_3 = arith.constant 0 : index
    %c0_4 = arith.constant 0 : index
    %3 = vector.load %arg3[%c0_3, %c0_4] : memref<1x128xf32, #tpu.memory_space<vmem>>, vector<1x128xf32>
    %4 = vector.broadcast %3 : vector<1x128xf32> to vector<8x128xf32>
    %5 = arith.addf %2, %4 : vector<8x128xf32>
    %cst_5 = arith.constant 0.000000e+00 : f32
    %6 = vector.broadcast %cst_5 : f32 to vector<8x128xf32>
    %7 = arith.maximumf %5, %6 : vector<8x128xf32>
    %c0_6 = arith.constant 0 : index
    %c0_7 = arith.constant 0 : index
    %8 = vector.load %arg4[%c0_6, %c0_7] : memref<128x64xf32, #tpu.memory_space<vmem>>, vector<128x64xf32>
    %cst_8 = arith.constant dense<0.000000e+00> : vector<8x64xf32>
    %9 = tpu.matmul %7, %8, %cst_8 {dimension_numbers = #tpu.dot_dimension_numbers<[1], [0], [0], [1], [0, 0, 1, 1], [], []>} : vector<8x128xf32>, vector<128x64xf32>, vector<8x64xf32> -> vector<8x64xf32>
    %c0_9 = arith.constant 0 : index
    %c0_10 = arith.constant 0 : index
    %10 = vector.load %arg5[%c0_9, %c0_10] : memref<1x64xf32, #tpu.memory_space<vmem>>, vector<1x64xf32>
    %11 = vector.broadcast %10 : vector<1x64xf32> to vector<8x64xf32>
    %12 = arith.addf %9, %11 : vector<8x64xf32>
    %cst_11 = arith.constant 0.000000e+00 : f32
    %13 = vector.broadcast %cst_11 : f32 to vector<8x64xf32>
    %14 = arith.maximumf %12, %13 : vector<8x64xf32>
    %c0_12 = arith.constant 0 : index
    %c0_13 = arith.constant 0 : index
    %15 = vector.load %arg6[%c0_12, %c0_13] : memref<64x32xf32, #tpu.memory_space<vmem>>, vector<64x32xf32>
    %cst_14 = arith.constant dense<0.000000e+00> : vector<8x32xf32>
    %16 = tpu.matmul %14, %15, %cst_14 {dimension_numbers = #tpu.dot_dimension_numbers<[1], [0], [0], [1], [0, 0, 1, 1], [], []>} : vector<8x64xf32>, vector<64x32xf32>, vector<8x32xf32> -> vector<8x32xf32>
    %c0_15 = arith.constant 0 : index
    %c0_16 = arith.constant 0 : index
    %17 = vector.load %arg7[%c0_15, %c0_16] : memref<1x32xf32, #tpu.memory_space<vmem>>, vector<1x32xf32>
    %18 = vector.broadcast %17 : vector<1x32xf32> to vector<8x32xf32>
    %19 = arith.addf %16, %18 : vector<8x32xf32>
    %cst_17 = arith.constant 0.000000e+00 : f32
    %20 = vector.broadcast %cst_17 : f32 to vector<8x32xf32>
    %21 = arith.maximumf %19, %20 : vector<8x32xf32>
    %c0_18 = arith.constant 0 : index
    %c0_19 = arith.constant 0 : index
    %22 = vector.load %arg8[%c0_18, %c0_19] : memref<32x8xf32, #tpu.memory_space<vmem>>, vector<32x8xf32>
    %cst_20 = arith.constant dense<0.000000e+00> : vector<8x8xf32>
    %23 = tpu.matmul %21, %22, %cst_20 {dimension_numbers = #tpu.dot_dimension_numbers<[1], [0], [0], [1], [0, 0, 1, 1], [], []>} : vector<8x32xf32>, vector<32x8xf32>, vector<8x8xf32> -> vector<8x8xf32>
    %c0_21 = arith.constant 0 : index
    %c0_22 = arith.constant 0 : index
    %24 = vector.load %arg9[%c0_21, %c0_22] : memref<1x8xf32, #tpu.memory_space<vmem>>, vector<1x8xf32>
    %25 = vector.broadcast %24 : vector<1x8xf32> to vector<8x8xf32>
    %26 = arith.addf %23, %25 : vector<8x8xf32>
    %c0_23 = arith.constant 0 : index
    %c0_24 = arith.constant 0 : index
    %27 = vector.load %arg10[%c0_23, %c0_24] : memref<8x8xf32, #tpu.memory_space<vmem>>, vector<8x8xf32>
    tpu.vector_store %arg10[%c0_23, %c0_24], %26 {strides = array<i32>} : memref<8x8xf32, #tpu.memory_space<vmem>>, vector<8x8xf32>,
    return
  }
  func.func @transform_0(%arg0: i32) -> (i32, i32) {
    %c0_i32 = arith.constant 0 : i32
    %c0_i32_0 = arith.constant 0 : i32
    return %arg0, %c0_i32 : i32, i32
  }
  func.func @transform_1(%arg0: i32) -> (i32, i32) {
    %c0_i32 = arith.constant 0 : i32
    %c0_i32_0 = arith.constant 0 : i32
    %c0_i32_1 = arith.constant 0 : i32
    return %c0_i32, %c0_i32_0 : i32, i32
  }
  func.func @transform_2(%arg0: i32) -> (i32, i32) {
    %c0_i32 = arith.constant 0 : i32
    %c0_i32_0 = arith.constant 0 : i32
    %c0_i32_1 = arith.constant 0 : i32
    return %c0_i32, %c0_i32_0 : i32, i32
  }
  func.func @transform_3(%arg0: i32) -> (i32, i32) {
    %c0_i32 = arith.constant 0 : i32
    %c0_i32_0 = arith.constant 0 : i32
    %c0_i32_1 = arith.constant 0 : i32
    return %c0_i32, %c0_i32_0 : i32, i32
  }
  func.func @transform_4(%arg0: i32) -> (i32, i32) {
    %c0_i32 = arith.constant 0 : i32
    %c0_i32_0 = arith.constant 0 : i32
    %c0_i32_1 = arith.constant 0 : i32
    return %c0_i32, %c0_i32_0 : i32, i32
  }
  func.func @transform_5(%arg0: i32) -> (i32, i32) {
    %c0_i32 = arith.constant 0 : i32
    %c0_i32_0 = arith.constant 0 : i32
    %c0_i32_1 = arith.constant 0 : i32
    return %c0_i32, %c0_i32_0 : i32, i32
  }
  func.func @transform_6(%arg0: i32) -> (i32, i32) {
    %c0_i32 = arith.constant 0 : i32
    %c0_i32_0 = arith.constant 0 : i32
    %c0_i32_1 = arith.constant 0 : i32
    return %c0_i32, %c0_i32_0 : i32, i32
  }
  func.func @transform_7(%arg0: i32) -> (i32, i32) {
    %c0_i32 = arith.constant 0 : i32
    %c0_i32_0 = arith.constant 0 : i32
    %c0_i32_1 = arith.constant 0 : i32
    return %c0_i32, %c0_i32_0 : i32, i32
  }
  func.func @transform_8(%arg0: i32) -> (i32, i32) {
    %c0_i32 = arith.constant 0 : i32
    %c0_i32_0 = arith.constant 0 : i32
    %c0_i32_1 = arith.constant 0 : i32
    return %c0_i32, %c0_i32_0 : i32, i32
  }
  func.func @transform_9(%arg0: i32) -> (i32, i32) {
    %c0_i32 = arith.constant 0 : i32
    %c0_i32_0 = arith.constant 0 : i32
    return %arg0, %c0_i32 : i32, i32
  }
}

</mosaic_0001>

<bundles_post_ra>
// kernel: tpu_custom_call.1
= control target key start
LH: loop header
LB: loop body
LE: loop exit
PB: predicated region body
PF: predicated region fallthrough
CT: control target
= control target key end

     0   :  { %v599_v3 = vmov 0.0|0.0   ;;  %vm600_vm0 = vmmov 0   ;;  %v601_v6 = vmov 0.0   ;;  %s802_s0 = inlined_call_operand.vmem [shape: f32[8,32], index: 0, kind: input, shape index: {}]   ;;  %s803_s1 = inlined_call_operand.vmem [shape: f32[32,128], index: 1, kind: input, shape index: {}]   ;;  %s804_s2 = inlined_call_operand.vmem [shape: f32[1,128], index: 2, kind: input, shape index: {}]   ;;  %s805_s3 = inlined_call_operand.vmem [shape: f32[128,64], index: 3, kind: input, shape index: {}]   ;;  %s806_s4 = inlined_call_operand.vmem [shape: f32[1,64], index: 4, kind: input, shape index: {}]   ;;  %s807_s5 = inlined_call_operand.vmem [shape: f32[64,32], index: 5, kind: input, shape index: {}]   ;;  %s808_s6 = inlined_call_operand.vmem [shape: f32[1,32], index: 6, kind: input, shape index: {}]   ;;  %s809_s7 = inlined_call_operand.vmem [shape: f32[32,8], index: 7, kind: input, shape index: {}]   ;;  %s810_s8 = inlined_call_operand.vmem [shape: f32[1,8], index: 8, kind: input, shape index: {}]   ;;  %s811_s9 = inlined_call_operand.hbm [shape: f32[8,8], index: 9, kind: output, shape index: {}]  }
   0x1   :  { %v34_v0 = vld [vmem:[%s803_s1] sm:$0xff]  ;;  %v35_v1 = vld [vmem:[%s803_s1 + $0x8] sm:$0xff]  ;;  %v36_v2 = vld [vmem:[%s803_s1 + $0x10] sm:$0xff]  ;;  %523 = vmatprep.subr.bf16.mxu0 %v599_v3  ;;  %455 = vmatprep.mubr.msk.f32.mxu0 %vm600_vm0, %v601_v6 }
   0x2   :  { %v524_v4 = vpack.c.bf16 %v35_v1, %v34_v0  ;;  %v37_v5 = vld [vmem:[%s803_s1 + $0x18] sm:$0xff]  ;;  %v120_v7 = vld [vmem:[%s805_s3] sm:$0xff]  ;;  %529 = vmatprep.subr.bf16.mxu1 %v599_v3  ;;  %v121_v8 = vld [vmem:[%s805_s3 + $0x8] sm:$0xff]  ;;  %490 = vmatprep.mubr.msk.f32.mxu1 %vm600_vm0, %v601_v6 }
   0x3   :  { %v122_v9 = vld [vmem:[%s805_s3 + $0x10] sm:$0xff]  ;;  %v123_v10 = vld [vmem:[%s805_s3 + $0x18] sm:$0xff]  ;;  %v527_v11 = vpack.c.bf16 %v37_v5, %v36_v2  ;;  %v530_v12 = vpack.c.bf16 %v121_v8, %v120_v7  ;;  %v124_v14 = vld [vmem:[%s805_s3 + $0x20] sm:$0xff] }
   0x4   :  { %525 = vmatpush3.bf16.msra.mxu0 %v524_v4  ;;  %v533_v13 = vpack.c.bf16 %v123_v10, %v122_v9  ;;  %v125_v15 = vld [vmem:[%s805_s3 + $0x28] sm:$0xff] }
   0x5   :  { %526 = vmatprep.subr.bf16.mxu0 %v599_v3  ;;  %531 = vmatpush3.bf16.msra.mxu1 %v530_v12 }
   0x6   :  { %532 = vmatprep.subr.bf16.mxu1 %v599_v3 }
   0x7   :  { %14 = vsyncpa [#allocation3], 0  ;;  %v33_v16 = vld [vmem:[%s802_s0] sm:$0xff]  ;;  %vm45_vm1 = vcmask 261120   ;;  %v536_v17 = vpack.c.bf16 %v125_v15, %v124_v14  ;;  %v126_v18 = vld [vmem:[%s805_s3 + $0x30] sm:$0xff]  ;;  %vm229_vm2 = vcmask 523264  }
   0x8   :  { %528 = vmatpush3.bf16.msra.mxu0 %v527_v11  ;;  %v127_v19 = vld [vmem:[%s805_s3 + $0x38] sm:$0xff]  ;;  %v128_v21 = vld [vmem:[%s805_s3 + $0x40] sm:$0xff]  ;;  %v129_v22 = vld [vmem:[%s805_s3 + $0x48] sm:$0xff]  ;;  %s602_s11 = smov [#allocation2]   ;;  %vm388_vm3 = vcmask 64512  }
   0x9   :  { %553 = vmatprep.subr.bf16.mxu0 %v599_v3  ;;  %534 = vmatpush3.bf16.msra.mxu1 %v533_v13  ;;  %v539_v20 = vpack.c.bf16 %v127_v19, %v126_v18  ;;  %v542_v23 = vpack.c.bf16 %v129_v22, %v128_v21  ;;  %v130_v24 = vld [vmem:[%s805_s3 + $0x50] sm:$0xff]  ;;  %v131_v25 = vld [vmem:[%s805_s3 + $0x58] sm:$0xff]  ;;  %v132_v27 = vld [vmem:[%s805_s3 + $0x60] sm:$0xff]  ;;  %s396_s12 = sshll.u32 %s602_s11, 4  ;;  %s397_s12 = int_to_ptr.vmem [resolvable:$true] %s396_s12 }
   0xa   :  { %535 = vmatprep.subr.bf16.mxu1 %v599_v3  ;;  %v545_v26 = vpack.c.bf16 %v131_v25, %v130_v24  ;;  %v133_v28 = vld [vmem:[%s805_s3 + $0x68] sm:$0xff]  ;;  %v134_v30 = vld [vmem:[%s805_s3 + $0x70] sm:$0xff]  ;;  %v135_v31 = vld [vmem:[%s805_s3 + $0x78] sm:$0xff]  ;;  %p580_p1 = scmp.lt.s32.totalorder %s397_s12, %s397_s12 }
   0xb   :  { %456 = vmatmul.mubr.msk.f32.vlgmr.msra.gmra.mrb[0].mxu0 %vm45_vm1, %v33_v16  ;;  %v548_v29 = vpack.c.bf16 %v133_v28, %v132_v27  ;;  %v551_v32 = vpack.c.bf16 %v135_v31, %v134_v30  ;;  %v214_v33 = vld [vmem:[%s807_s5] sm:$0xff]  ;;  %v215_v34 = vld [vmem:[%s807_s5 + $0x8] sm:$0xff]  ;;  %v216_v35 = vld [vmem:[%s807_s5 + $0x10] sm:$0xff] }
   0xc   :  { %509 = vmatprep.mubr.msk.f32.mxu0 %vm600_vm0, %v601_v6  ;;  %v554_v36 = vpack.c.bf16 %v215_v34, %v214_v33  ;;  %v217_v37 = vld [vmem:[%s807_s5 + $0x18] sm:$0xff]  ;;  %v218_v39 = vld [vmem:[%s807_s5 + $0x20] sm:$0xff]  ;;  %v219_v40 = vld [vmem:[%s807_s5 + $0x28] sm:$0xff] }
   0xd   :  { %537 = vmatpush3.bf16.msra.mxu1 %v536_v17  ;;  %v557_v38 = vpack.c.bf16 %v217_v37, %v216_v35  ;;  %v560_v41 = vpack.c.bf16 %v219_v40, %v218_v39  ;;  %v404_v42 = vld [vmem:[%s804_s2] ss:$0 sm:$0xff]  ;;  %v220_v47 = vld [vmem:[%s807_s5 + $0x30] sm:$0xff]  ;;  %v221_v48 = vld [vmem:[%s807_s5 + $0x38] sm:$0xff] }
   0xe   :  { %538 = vmatprep.subr.bf16.mxu1 %v599_v3  ;;  %555 = vmatpush3.bf16.msra.mxu0 %v554_v36  ;;  %v563_v49 = vpack.c.bf16 %v221_v48, %v220_v47  ;;  %v406_v50 = vld [vmem:[%s806_s4] ss:$0 sm:$0xff]  ;;  %v305_v52 = vld [vmem:[%s809_s7 + $0x8] sm:$0xff]  ;;  %v306_v58 = vld [vmem:[%s809_s7 + $0x10] sm:$0xff] }
   0xf   :  { %556 = vmatprep.subr.bf16.mxu0 %v599_v3  ;;  %v304_v51 = vld [vmem:[%s809_s7] sm:$0xff]  ;;  %v307_v59 = vld [vmem:[%s809_s7 + $0x18] sm:$0xff]  ;;  %s575_s7 = scalar_lea.vmem %s397_s12, 128 }
  0x10   :  { %v566_v56 = vpack.c.bf16 %v305_v52, %v304_v51  ;;  %v569_v60 = vpack.c.bf16 %v307_v59, %v306_v58  ;;  %v407_v61 = vld [vmem:[%s808_s6] ss:$0 sm:$0xff]  ;;  %p576_p0 = scmp.ne.s32.totalorder %s397_s12, %s575_s7  ;;  %p581_p2 = scmp.lt.s32.totalorder %s575_s7, %s575_s7 }
  0x11   :  { %540 = vmatpush3.bf16.msra.mxu1 %v539_v20  ;;  %v409_v2 = vld [vmem:[%s810_s8] ss:$0 sm:$0xff] }
  0x12   :  { %541 = vmatprep.subr.bf16.mxu1 %v599_v3  ;;  %558 = vmatpush3.bf16.msra.mxu0 %v557_v38  ;;  %p582_p3 = por %p581_p2, %p580_p1 }
  0x13   :  { %559 = vmatprep.subr.bf16.mxu0 %v599_v3 }
  0x14   :  { %p583_p4 = pnand %p582_p3, %p576_p0 }
  0x15   :  { %543 = vmatpush3.bf16.msra.mxu1 %v542_v23 }
  0x16   :  { %544 = vmatprep.subr.bf16.mxu1 %v599_v3  ;;  %561 = vmatpush3.bf16.msra.mxu0 %v560_v41 }
  0x17   :  { %562 = vmatprep.subr.bf16.mxu0 %v599_v3 }
  0x19   :  { %546 = vmatpush3.bf16.msra.mxu1 %v545_v26 }
  0x1a   :  { %547 = vmatprep.subr.bf16.mxu1 %v599_v3  ;;  %564 = vmatpush3.bf16.msra.mxu0 %v563_v49 }
  0x1b   :  { %565 = vmatprep.subr.bf16.mxu0 %v599_v3 }
  0x1d   :  { %549 = vmatpush3.bf16.msra.mxu1 %v548_v29 }
  0x1e   :  { %550 = vmatprep.subr.bf16.mxu1 %v599_v3 }
  0x21   :  { %552 = vmatpush3.bf16.msra.mxu1 %v551_v32 }
  0xde   :  { %v115_v43 = vpop.f32.mrb[0].mxu0 }
  0xdf   :  { %v116_v44 = vadd.f32 %v404_v42, %v115_v43  ;;  %v457_v45 = vpop.f32.mrb[1].mxu0 }
  0xe1   :  { %v119_v46 = vmax.f32 %v116_v44, 0.0 }
  0xe3   :  { %491 = vmatmul.mubr.f32.vlgmr.msra.gmra.mrb[0].mxu1 %v119_v46 }
 0x1b6   :  { %v209_v53 = vpop.f32.mrb[0].mxu1 }
 0x1b7   :  { %v210_v54 = vadd.f32 %v406_v50, %v209_v53  ;;  %v492_v55 = vpop.f32.mrb[1].mxu1 }
 0x1b9   :  { %v213_v57 = vmax.f32 %v210_v54, 0.0 }
 0x1bb   :  { %510 = vmatmul.mubr.msk.f32.vlgmr.msra.gmra.mrb[2].mxu0 %vm229_vm2, %v213_v57 }
 0x1bc   :  { %567 = vmatpush3.bf16.msra.mxu0 %v566_v56  ;;  %520 = vmatprep.mubr.msk.f32.mxu0 %vm600_vm0, %v601_v6 }
 0x1bd   :  { %568 = vmatprep.subr.bf16.mxu0 %v599_v3 }
 0x1c0   :  { %570 = vmatpush3.bf16.msra.mxu0 %v569_v60 }
 0x28e   :  { %v299_v62 = vpop.f32.mrb[2].mxu0 }
 0x28f   :  { %v300_v63 = vadd.f32 %v407_v61, %v299_v62  ;;  %v511_v0 = vpop.f32.mrb[3].mxu0 }
 0x291   :  { %v303_v1 = vmax.f32 %v300_v63, 0.0 }
 0x293   :  { %521 = vmatmul.mubr.msk.f32.vlgmr.msra.gmra.mrb[4].mxu0 %vm45_vm1, %v303_v1 }
 0x366   :  { %v384_v3 = vpop.f32.mrb[4].mxu0 }
 0x367   :  { %v385_v4 = vadd.f32 %v409_v2, %v384_v3  ;;  %v522_v5 = vpop.f32.mrb[5].mxu0 }
 0x369   :  { %389 = vst.msk [vmem:[#allocation2] sm:$0xff] %vm388_vm3, %v385_v4 }
 0x36a   :  { %586 = shalt.err (!%p583_p4)
}
 0x36b   :  { %s587_s3 = scalar_lea.hbm %s811_s9, 128 }
 0x36c   :  { %p588_p5 = scmp.ne.s32.totalorder %s811_s9, %s587_s3  ;;  %p591_p6 = scmp.lt.u32.totalorder %s587_s3, %s811_s9 }
 0x36e   :  { %p593_p7 = pnand %p591_p6, %p588_p5 }
 0x370   :  { %596 = shalt.err (!%p593_p7)
}
 0x371   :  { %399 = dma.vmem_to_hbm [thread:$0]  %s397_s12, 128, %s811_s9, [#allocation3]  }
 0x372   :  { %597 = dma.done.wait [#allocation3], 128  }
 0x373   :  { %598 = vsyncadd [#allocation3], 4294967168 }
 0x374   :  { %403 = vsyncpa [#allocation3], 1 }

</bundles_post_ra>
